<compile_context>
chip_gen: v7x
topology: tpu7x:2x2x1
jax: 0.10.0
libtpu: 0.0.40
codegen_flags: <defaults>
</compile_context>

<pallas_src>
import jax
import jax.numpy as jnp
from jax.experimental import pallas as pl
from jax.experimental.pallas import tpu as pltpu

D_IN, D_H1, D_H2, D_OUT = 768, 384, 128, 2
D_OUT_PAD = 128          # lane-dense padded width of the last layer
MAX_TB = 2048            # max batch tile (multiple of 16); ~18 MiB peak VMEM
VMEM_LIMIT_BYTES = 32 * 1024 * 1024


def _round_up(a, m):
    return ((a + m - 1) // m) * m


def _classifier_kernel(x_ref, w1_ref, b1_ref, w2_ref, b2_ref, w3_ref, b3_ref,
                       o_ref):
    # Cast x f32 -> bf16 in-kernel (no wrapper-side HBM pass for the cast).
    x = x_ref[...].astype(jnp.bfloat16)
    # Layer 1: (TB, 768) bf16 @ (768, 384) bf16 -> f32 acc, bias + tanh in f32
    h1 = jnp.dot(x, w1_ref[...],
                 preferred_element_type=jnp.float32) + b1_ref[...]
    h1 = jnp.tanh(h1)
    # Layer 2: (TB, 384) @ (384, 128)
    h2 = jnp.dot(h1.astype(jnp.bfloat16), w2_ref[...],
                 preferred_element_type=jnp.float32) + b2_ref[...]
    h2 = jnp.tanh(h2)
    # Layer 3 (padded to 128 lanes): (TB, 128) @ (128, 128); bf16 writeback.
    o_ref[...] = (jnp.dot(h2.astype(jnp.bfloat16), w3_ref[...],
                          preferred_element_type=jnp.float32)
                  + b3_ref[...]).astype(o_ref.dtype)


def prepare_params(params):
    """One-time weight prep: bf16 MXU weights, zero-padded 128-wide last layer.

    Call once (outside the per-step forward path); keeps the invariant that
    padded output columns 2..127 are exactly zero.
    """
    return {
        "w1": params["w1"].astype(jnp.bfloat16),
        "b1": params["b1"].astype(jnp.float32),
        "w2": params["w2"].astype(jnp.bfloat16),
        "b2": params["b2"].astype(jnp.float32),
        "w3": jnp.pad(params["w3"],
                      ((0, 0), (0, D_OUT_PAD - D_OUT))).astype(jnp.bfloat16),
        "b3": jnp.pad(params["b3"].astype(jnp.float32),
                      ((0, 0), (0, D_OUT_PAD - D_OUT))),
    }


def _compute_tiling(B):
    """Pick (TB, B_pad, num_tiles): TB multiple of 16, <= MAX_TB, >=2 tiles
    when the batch is big enough (v7x megacore), minimal padded rows."""
    B16 = _round_up(B, 16)
    if B16 <= 32:
        num_tiles = 1
    else:
        num_tiles = max(2, pl.cdiv(B16, MAX_TB))
    TB = _round_up(pl.cdiv(B16, num_tiles), 16)
    B_pad = num_tiles * TB
    return TB, B_pad, num_tiles


def classifier_forward(x, prepared):
    """x: (B, 768) float32. prepared: output of prepare_params()."""
    B = x.shape[0]
    TB, B_pad, num_tiles = _compute_tiling(B)

    # Only pad when needed; padding waste is at most ~16*num_tiles rows.
    if B_pad != B:
        x = jnp.pad(x, ((0, B_pad - B), (0, 0)))

    out = pl.pallas_call(
        _classifier_kernel,
        out_shape=jax.ShapeDtypeStruct((B_pad, D_OUT_PAD), jnp.bfloat16),
        grid=(num_tiles,),
        in_specs=[
            pl.BlockSpec((TB, D_IN), lambda i: (i, 0)),       # x: tiled on batch
            pl.BlockSpec((D_IN, D_H1), lambda i: (0, 0)),     # weights resident
            pl.BlockSpec((1, D_H1), lambda i: (0, 0)),
            pl.BlockSpec((D_H1, D_H2), lambda i: (0, 0)),
            pl.BlockSpec((1, D_H2), lambda i: (0, 0)),
            pl.BlockSpec((D_H2, D_OUT_PAD), lambda i: (0, 0)),
            pl.BlockSpec((1, D_OUT_PAD), lambda i: (0, 0)),
        ],
        out_specs=pl.BlockSpec((TB, D_OUT_PAD), lambda i: (i, 0)),
        compiler_params=pltpu.CompilerParams(
            dimension_semantics=("parallel",),
            vmem_limit_bytes=VMEM_LIMIT_BYTES),
    )(x, prepared["w1"], prepared["b1"], prepared["w2"], prepared["b2"],
      prepared["w3"], prepared["b3"])

    # NOTE: for large B, fuse the downstream op (softmax/argmax/loss) here
    # instead of materialising the slice; for the tiny (B, 2) logits this is
    # negligible.
    return out[:B, :D_OUT].astype(jnp.float32)


def init_params(key):
    """Deterministic init mimicking nn.Linear's uniform(-1/sqrt(in), 1/sqrt(in))."""
    ks = jax.random.split(key, 6)

    def linear(kw, kb, d_in, d_out):
        bound = 1.0 / jnp.sqrt(jnp.float32(d_in))
        w = jax.random.uniform(kw, (d_in, d_out), jnp.float32, -bound, bound)
        b = jax.random.uniform(kb, (1, d_out), jnp.float32, -bound, bound)
        return w, b

    w1, b1 = linear(ks[0], ks[1], D_IN, D_H1)
    w2, b2 = linear(ks[2], ks[3], D_H1, D_H2)
    w3, b3 = linear(ks[4], ks[5], D_H2, D_OUT)
    return {"w1": w1, "b1": b1, "w2": w2, "b2": b2, "w3": w3, "b3": b3}


def _reference(x, p):
    """Pure-JAX reference using the same bf16-input / f32-accumulate recipe."""
    h1 = jnp.tanh(
        jnp.dot(x.astype(jnp.bfloat16), p["w1"].astype(jnp.bfloat16),
                preferred_element_type=jnp.float32) + p["b1"])
    h2 = jnp.tanh(
        jnp.dot(h1.astype(jnp.bfloat16), p["w2"].astype(jnp.bfloat16),
                preferred_element_type=jnp.float32) + p["b2"])
    return (jnp.dot(h2.astype(jnp.bfloat16), p["w3"].astype(jnp.bfloat16),
                    preferred_element_type=jnp.float32) + p["b3"])


if __name__ == "__main__":
    key = jax.random.PRNGKey(0)
    k_x, k_p = jax.random.split(key)

    B = 8
    x = jax.random.normal(k_x, (B, D_IN), jnp.float32)
    params = init_params(k_p)
    prepared = prepare_params(params)      # one-time weight prep

    out = jax.jit(classifier_forward)(x, prepared)
    out = jax.block_until_ready(out)

    ref = _reference(x, params)
    assert out.shape == (B, D_OUT), out.shape
    assert jnp.allclose(out, ref, atol=2e-2, rtol=2e-2), (
        float(jnp.max(jnp.abs(out - ref))))

    print("KERNEL_OK")
</pallas_src>

<mosaic_0001>
module attributes {stable_mosaic.version = 11 : i64} {
  func.func @_classifier_kernel(%arg0: i32, %arg1: memref<16x768xf32, #tpu.memory_space<vmem>>, %arg2: memref<768x384xbf16, #tpu.memory_space<vmem>>, %arg3: memref<1x384xf32, #tpu.memory_space<vmem>>, %arg4: memref<384x128xbf16, #tpu.memory_space<vmem>>, %arg5: memref<1x128xf32, #tpu.memory_space<vmem>>, %arg6: memref<128x128xbf16, #tpu.memory_space<vmem>>, %arg7: memref<1x128xf32, #tpu.memory_space<vmem>>, %arg8: memref<16x128xbf16, #tpu.memory_space<vmem>>) attributes {dimension_semantics = [#tpu.dimension_semantics<parallel>], iteration_bounds = array<i64: 1>, scalar_prefetch = 0 : i64, scratch_operands = 0 : i64, tpu.core_type = #tpu.core_type<tc>, window_params = [{transform_indices = @transform_0, window_bounds = array<i64: 16, 768>}, {pipeline_mode = #tpu.pipeline_mode<synchronous>, transform_indices = @transform_1, window_bounds = array<i64: 768, 384>}, {pipeline_mode = #tpu.pipeline_mode<synchronous>, transform_indices = @transform_2, window_bounds = array<i64: 1, 384>}, {pipeline_mode = #tpu.pipeline_mode<synchronous>, transform_indices = @transform_3, window_bounds = array<i64: 384, 128>}, {pipeline_mode = #tpu.pipeline_mode<synchronous>, transform_indices = @transform_4, window_bounds = array<i64: 1, 128>}, {pipeline_mode = #tpu.pipeline_mode<synchronous>, transform_indices = @transform_5, window_bounds = array<i64: 128, 128>}, {pipeline_mode = #tpu.pipeline_mode<synchronous>, transform_indices = @transform_6, window_bounds = array<i64: 1, 128>}, {transform_indices = @transform_7, window_bounds = array<i64: 16, 128>}]} {
    %c0 = arith.constant 0 : index
    %c0_0 = arith.constant 0 : index
    %0 = vector.load %arg1[%c0, %c0_0] : memref<16x768xf32, #tpu.memory_space<vmem>>, vector<16x768xf32>
    %1 = arith.truncf %0 : vector<16x768xf32> to vector<16x768xbf16>
    %c0_1 = arith.constant 0 : index
    %c0_2 = arith.constant 0 : index
    %2 = vector.load %arg2[%c0_1, %c0_2] : memref<768x384xbf16, #tpu.memory_space<vmem>>, vector<768x384xbf16>
    %cst = arith.constant dense<0.000000e+00> : vector<16x384xf32>
    %3 = tpu.matmul %1, %2, %cst {dimension_numbers = #tpu.dot_dimension_numbers<[1], [0], [0], [1], [0, 0, 1, 1], [], []>} : vector<16x768xbf16>, vector<768x384xbf16>, vector<16x384xf32> -> vector<16x384xf32>
    %c0_3 = arith.constant 0 : index
    %c0_4 = arith.constant 0 : index
    %4 = vector.load %arg3[%c0_3, %c0_4] : memref<1x384xf32, #tpu.memory_space<vmem>>, vector<1x384xf32>
    %5 = vector.broadcast %4 : vector<1x384xf32> to vector<16x384xf32>
    %6 = arith.addf %3, %5 : vector<16x384xf32>
    %7 = math.tanh %6 : vector<16x384xf32>
    %8 = arith.truncf %7 : vector<16x384xf32> to vector<16x384xbf16>
    %c0_5 = arith.constant 0 : index
    %c0_6 = arith.constant 0 : index
    %9 = vector.load %arg4[%c0_5, %c0_6] : memref<384x128xbf16, #tpu.memory_space<vmem>>, vector<384x128xbf16>
    %cst_7 = arith.constant dense<0.000000e+00> : vector<16x128xf32>
    %10 = tpu.matmul %8, %9, %cst_7 {dimension_numbers = #tpu.dot_dimension_numbers<[1], [0], [0], [1], [0, 0, 1, 1], [], []>} : vector<16x384xbf16>, vector<384x128xbf16>, vector<16x128xf32> -> vector<16x128xf32>
    %c0_8 = arith.constant 0 : index
    %c0_9 = arith.constant 0 : index
    %11 = vector.load %arg5[%c0_8, %c0_9] : memref<1x128xf32, #tpu.memory_space<vmem>>, vector<1x128xf32>
    %12 = vector.broadcast %11 : vector<1x128xf32> to vector<16x128xf32>
    %13 = arith.addf %10, %12 : vector<16x128xf32>
    %14 = math.tanh %13 : vector<16x128xf32>
    %15 = arith.truncf %14 : vector<16x128xf32> to vector<16x128xbf16>
    %c0_10 = arith.constant 0 : index
    %c0_11 = arith.constant 0 : index
    %16 = vector.load %arg6[%c0_10, %c0_11] : memref<128x128xbf16, #tpu.memory_space<vmem>>, vector<128x128xbf16>
    %cst_12 = arith.constant dense<0.000000e+00> : vector<16x128xf32>
    %17 = tpu.matmul %15, %16, %cst_12 {dimension_numbers = #tpu.dot_dimension_numbers<[1], [0], [0], [1], [0, 0, 1, 1], [], []>} : vector<16x128xbf16>, vector<128x128xbf16>, vector<16x128xf32> -> vector<16x128xf32>
    %c0_13 = arith.constant 0 : index
    %c0_14 = arith.constant 0 : index
    %18 = vector.load %arg7[%c0_13, %c0_14] : memref<1x128xf32, #tpu.memory_space<vmem>>, vector<1x128xf32>
    %19 = vector.broadcast %18 : vector<1x128xf32> to vector<16x128xf32>
    %20 = arith.addf %17, %19 : vector<16x128xf32>
    %21 = arith.truncf %20 : vector<16x128xf32> to vector<16x128xbf16>
    %c0_15 = arith.constant 0 : index
    %c0_16 = arith.constant 0 : index
    %22 = vector.load %arg8[%c0_15, %c0_16] : memref<16x128xbf16, #tpu.memory_space<vmem>>, vector<16x128xbf16>
    tpu.vector_store %arg8[%c0_15, %c0_16], %21 {strides = array<i32>} : memref<16x128xbf16, #tpu.memory_space<vmem>>, vector<16x128xbf16>,
    return
  }
  func.func @transform_0(%arg0: i32) -> (i32, i32) {
    %c0_i32 = arith.constant 0 : i32
    %c0_i32_0 = arith.constant 0 : i32
    return %arg0, %c0_i32 : i32, i32
  }
  func.func @transform_1(%arg0: i32) -> (i32, i32) {
    %c0_i32 = arith.constant 0 : i32
    %c0_i32_0 = arith.constant 0 : i32
    %c0_i32_1 = arith.constant 0 : i32
    return %c0_i32, %c0_i32_0 : i32, i32
  }
  func.func @transform_2(%arg0: i32) -> (i32, i32) {
    %c0_i32 = arith.constant 0 : i32
    %c0_i32_0 = arith.constant 0 : i32
    %c0_i32_1 = arith.constant 0 : i32
    return %c0_i32, %c0_i32_0 : i32, i32
  }
  func.func @transform_3(%arg0: i32) -> (i32, i32) {
    %c0_i32 = arith.constant 0 : i32
    %c0_i32_0 = arith.constant 0 : i32
    %c0_i32_1 = arith.constant 0 : i32
    return %c0_i32, %c0_i32_0 : i32, i32
  }
  func.func @transform_4(%arg0: i32) -> (i32, i32) {
    %c0_i32 = arith.constant 0 : i32
    %c0_i32_0 = arith.constant 0 : i32
    %c0_i32_1 = arith.constant 0 : i32
    return %c0_i32, %c0_i32_0 : i32, i32
  }
  func.func @transform_5(%arg0: i32) -> (i32, i32) {
    %c0_i32 = arith.constant 0 : i32
    %c0_i32_0 = arith.constant 0 : i32
    %c0_i32_1 = arith.constant 0 : i32
    return %c0_i32, %c0_i32_0 : i32, i32
  }
  func.func @transform_6(%arg0: i32) -> (i32, i32) {
    %c0_i32 = arith.constant 0 : i32
    %c0_i32_0 = arith.constant 0 : i32
    %c0_i32_1 = arith.constant 0 : i32
    return %c0_i32, %c0_i32_0 : i32, i32
  }
  func.func @transform_7(%arg0: i32) -> (i32, i32) {
    %c0_i32 = arith.constant 0 : i32
    %c0_i32_0 = arith.constant 0 : i32
    return %arg0, %c0_i32 : i32, i32
  }
}

</mosaic_0001>

<bundles_post_ra>
// kernel: classifier_forward.1
= control target key start
LH: loop header
LB: loop body
LE: loop exit
PB: predicated region body
PF: predicated region fallthrough
CT: control target
= control target key end

     0   :  { %12 = vsyncpa [#allocation3], 0  ;;  %s2536_s0 = inlined_call_operand.vmem [shape: f32[16,768], index: 0, kind: input, shape index: {}]   ;;  %s2537_s1 = inlined_call_operand.hbm [shape: bf16[768,384], index: 1, kind: input, shape index: {}]   ;;  %s2538_s2 = inlined_call_operand.vmem [shape: f32[1,384], index: 2, kind: input, shape index: {}]   ;;  %s2539_s3 = inlined_call_operand.hbm [shape: bf16[384,128], index: 3, kind: input, shape index: {}]   ;;  %s2540_s4 = inlined_call_operand.vmem [shape: f32[1,128], index: 4, kind: input, shape index: {}]   ;;  %s2541_s5 = inlined_call_operand.vmem [shape: bf16[128,128], index: 5, kind: input, shape index: {}]   ;;  %s2542_s6 = inlined_call_operand.vmem [shape: f32[1,128], index: 6, kind: input, shape index: {}]   ;;  %s2543_s7 = inlined_call_operand.vmem [shape: bf16[16,128], index: 7, kind: output, shape index: {}]  }
   0x1   :  { %13 = vsyncpa [#allocation5], 0  ;;  %s2364_s24 = smov [#allocation2]   ;;  %s2316_s28 = scalar_lea.hbm %s2537_s1, 18432 }
   0x2   :  { %s21_s25 = sshll.u32 %s2364_s24, 4  ;;  %p2317_p0 = scmp.ne.s32.totalorder %s2537_s1, %s2316_s28  ;;  %s22_s25 = int_to_ptr.vmem [resolvable:$true] %s21_s25 }
   0x3   :  { %p2320_p1 = scmp.lt.u32.totalorder %s2316_s28, %s2537_s1 }
   0x5   :  { %p2322_p2 = pnand %p2320_p1, %p2317_p0 }
   0x7   :  { %2325 = shalt.err (!%p2322_p2)
}
   0x8   :  { %s2326_s10 = scalar_lea.vmem %s22_s25, 18432  ;;  %p2331_p4 = scmp.lt.s32.totalorder %s22_s25, %s22_s25 }
   0x9   :  { %p2327_p3 = scmp.ne.s32.totalorder %s22_s25, %s2326_s10  ;;  %p2332_p5 = scmp.lt.s32.totalorder %s2326_s10, %s2326_s10 }
   0xb   :  { %p2333_p6 = por %p2332_p5, %p2331_p4 }
   0xd   :  { %p2334_p7 = pnand %p2333_p6, %p2327_p3 }
   0xf   :  { %2337 = shalt.err (!%p2334_p7)
}
  0x10   :  { %s2365_s11 = smov 192   ;;  %s2366_s12 = smov 12  }
  0x11   :  { %27 = dma.hbm_to_vmem [thread:$0]  %s2537_s1, 18432, %s22_s25, [#allocation3], %s2365_s11, %s2365_s11, %s2366_s12  }
  0x12   :  { %s2367_s15 = smov [#allocation4]   ;;  %s2338_s19 = scalar_lea.hbm %s2539_s3, 3072 }
  0x13   :  { %s35_s16 = sshll.u32 %s2367_s15, 4  ;;  %p2339_p8 = scmp.ne.s32.totalorder %s2539_s3, %s2338_s19  ;;  %s36_s16 = int_to_ptr.vmem [resolvable:$true] %s35_s16 }
  0x14   :  { %p2342_p9 = scmp.lt.u32.totalorder %s2338_s19, %s2539_s3 }
  0x16   :  { %p2344_p10 = pnand %p2342_p9, %p2339_p8 }
  0x18   :  { %2347 = shalt.err (!%p2344_p10)
}
  0x19   :  { %s2348_s24 = scalar_lea.vmem %s36_s16, 3072  ;;  %p2353_p12 = scmp.lt.s32.totalorder %s36_s16, %s36_s16 }
  0x1a   :  { %p2349_p11 = scmp.ne.s32.totalorder %s36_s16, %s2348_s24  ;;  %p2354_p13 = scmp.lt.s32.totalorder %s2348_s24, %s2348_s24 }
  0x1c   :  { %p2355_p0 = por %p2354_p13, %p2353_p12 }
  0x1e   :  { %p2356_p1 = pnand %p2355_p0, %p2349_p11 }
  0x20   :  { %2359 = shalt.err (!%p2356_p1)
}
  0x21   :  { %s2368_s1 = smov 64   ;;  %s2369_s25 = smov 4  }
  0x22   :  { %41 = dma.hbm_to_vmem [thread:$0]  %s2539_s3, 3072, %s36_s16, [#allocation5], %s2368_s1, %s2368_s1, %s2369_s25  }
  0x23   :  { %2360 = dma.done.wait [#allocation3], 18432  }
  0x24   :  { %2361 = vsyncadd [#allocation3], 4294948864 }
  0x25   :  { %2362 = dma.done.wait [#allocation5], 3072  }
  0x26   :  { %2363 = vsyncadd [#allocation5], 4294964224  ;;  %v2076_v0 = vld [vmem:[#allocation2 + $0x4] ss:$12 sps:$4 sm:$0xff]   ;;  %v2078_v1 = vld [vmem:[#allocation2] ss:$12 sps:$4 sm:$0xff]  }
  0x27   :  { %1050 = vmatprep.subr.bf16.mxu0 %v2076_v0  ;;  %v2079_v2 = vld [vmem:[#allocation2 + $0x1c] ss:$12 sps:$4 sm:$0xff]   ;;  %v2081_v3 = vld [vmem:[#allocation2 + $0x18] ss:$12 sps:$4 sm:$0xff]   ;;  %v2082_v4 = vld [vmem:[#allocation2 + $0x34] ss:$12 sps:$4 sm:$0xff]  }
  0x28   :  { %1051 = vmatpush1.bf16.msra.mxu0 %v2078_v1  ;;  %v2084_v5 = vld [vmem:[#allocation2 + $0x30] ss:$12 sps:$4 sm:$0xff]   ;;  %v2085_v6 = vld [vmem:[#allocation2 + $0x4c] ss:$12 sps:$4 sm:$0xff]   ;;  %v2087_v7 = vld [vmem:[#allocation2 + $0x48] ss:$12 sps:$4 sm:$0xff]  }
  0x29   :  { %1052 = vmatprep.subr.bf16.mxu0 %v2079_v2  ;;  %v2088_v8 = vld [vmem:[#allocation2 + $0x64] ss:$12 sps:$4 sm:$0xff]   ;;  %v2090_v9 = vld [vmem:[#allocation2 + $0x60] ss:$12 sps:$4 sm:$0xff]   ;;  %v2091_v10 = vld [vmem:[#allocation2 + $0x7c] ss:$12 sps:$4 sm:$0xff]  }
  0x2a   :  { %v2093_v11 = vld [vmem:[#allocation2 + $0x78] ss:$12 sps:$4 sm:$0xff]   ;;  %v2094_v12 = vld [vmem:[#allocation2 + $0x94] ss:$12 sps:$4 sm:$0xff]   ;;  %v56_v13 = vld [vmem:[%s2536_s0 + $0x8] sm:$0xff]  ;;  %vm2371_vm0 = vmmov 0  }
  0x2b   :  { %v62_v14 = vld [vmem:[%s2536_s0 + $0x38] sm:$0xff]  ;;  %v2127_v18 = vld [vmem:[#allocation2 + $0xc8] ss:$12 sps:$4 sm:$0xff]   ;;  %v2100_v21 = vld [vmem:[#allocation2 + $0xc4] ss:$12 sps:$4 sm:$0xff]  }
  0x2c   :  { %1053 = vmatpush1.bf16.msra.mxu0 %v2081_v3  ;;  %v68_v15 = vpack.c.bf16 %v62_v14, %v56_v13  ;;  %v2096_v16 = vld [vmem:[#allocation2 + $0x90] ss:$12 sps:$4 sm:$0xff]   ;;  %v2097_v17 = vld [vmem:[#allocation2 + $0xac] ss:$12 sps:$4 sm:$0xff]   ;;  %v2128_v19 = vld [vmem:[#allocation2 + $0x8] ss:$12 sps:$4 sm:$0xff]   ;;  %1910 = vmatprep.subr.bf16.mxu1 %v2127_v18 }
  0x2d   :  { %1054 = vmatprep.subr.bf16.mxu0 %v2082_v4  ;;  %v2099_v20 = vld [vmem:[#allocation2 + $0xa8] ss:$12 sps:$4 sm:$0xff]   ;;  %1911 = vmatpush3.bf16.msra.mxu1 %v2128_v19  ;;  %v2132_v22 = vld [vmem:[#allocation2 + $0xe0] ss:$12 sps:$4 sm:$0xff]   ;;  %v2137_v26 = vld [vmem:[#allocation2 + $0xf8] ss:$12 sps:$4 sm:$0xff]  }
  0x2e   :  { %1082 = vmatprep.mubr.bf16.mxu0 %v68_v15  ;;  %1211 = vmatprep.mubr.bf16.mxu1 %v68_v15  ;;  %v2133_v23 = vld [vmem:[#allocation2 + $0x20] ss:$12 sps:$4 sm:$0xff]   ;;  %v2103_v25 = vld [vmem:[#allocation2 + $0xdc] ss:$12 sps:$4 sm:$0xff]   ;;  %v2138_v27 = vld [vmem:[#allocation2 + $0x38] ss:$12 sps:$4 sm:$0xff]  }
  0x2f   :  { %v2102_v24 = vld [vmem:[#allocation2 + $0xc0] ss:$12 sps:$4 sm:$0xff]   ;;  %1912 = vmatprep.subr.bf16.mxu1 %v2132_v22  ;;  %v2105_v28 = vld [vmem:[#allocation2 + $0xd8] ss:$12 sps:$4 sm:$0xff]   ;;  %v2142_v29 = vld [vmem:[#allocation2 + $0x110] ss:$12 sps:$4 sm:$0xff]  }
  0x30   :  { %1055 = vmatpush1.bf16.msra.mxu0 %v2084_v5  ;;  %v2143_v30 = vld [vmem:[#allocation2 + $0x50] ss:$12 sps:$4 sm:$0xff]   ;;  %v2106_v31 = vld [vmem:[#allocation2 + $0xf4] ss:$12 sps:$4 sm:$0xff]   ;;  %v2109_v35 = vld [vmem:[#allocation2 + $0x10c] ss:$12 sps:$4 sm:$0xff]  }
  0x31   :  { %1056 = vmatprep.subr.bf16.mxu0 %v2085_v6  ;;  %1913 = vmatpush3.bf16.msra.mxu1 %v2133_v23  ;;  %v2108_v32 = vld [vmem:[#allocation2 + $0xf0] ss:$12 sps:$4 sm:$0xff]   ;;  %v2147_v33 = vld [vmem:[#allocation2 + $0x128] ss:$12 sps:$4 sm:$0xff]   ;;  %v2152_v36 = vld [vmem:[#allocation2 + $0x140] ss:$12 sps:$4 sm:$0xff]  }
  0x32   :  { %1914 = vmatprep.subr.bf16.mxu1 %v2137_v26  ;;  %v2148_v34 = vld [vmem:[#allocation2 + $0x68] ss:$12 sps:$4 sm:$0xff]   ;;  %v2112_v38 = vld [vmem:[#allocation2 + $0x124] ss:$12 sps:$4 sm:$0xff]   ;;  %v2153_v39 = vld [vmem:[#allocation2 + $0x80] ss:$12 sps:$4 sm:$0xff]  }
  0x33   :  { %v2111_v37 = vld [vmem:[#allocation2 + $0x108] ss:$12 sps:$4 sm:$0xff]   ;;  %v2157_v40 = vld [vmem:[#allocation2 + $0x158] ss:$12 sps:$4 sm:$0xff]   ;;  %v2114_v41 = vld [vmem:[#allocation2 + $0x120] ss:$12 sps:$4 sm:$0xff]  }
  0x34   :  { %1057 = vmatpush1.bf16.msra.mxu0 %v2087_v7  ;;  %v2115_v42 = vld [vmem:[#allocation2 + $0x13c] ss:$12 sps:$4 sm:$0xff]   ;;  %v2158_v43 = vld [vmem:[#allocation2 + $0x98] ss:$12 sps:$4 sm:$0xff]   ;;  %v2118_v46 = vld [vmem:[#allocation2 + $0x154] ss:$12 sps:$4 sm:$0xff]  }
  0x35   :  { %1058 = vmatprep.subr.bf16.mxu0 %v2088_v8  ;;  %1915 = vmatpush3.bf16.msra.mxu1 %v2138_v27  ;;  %v2162_v44 = vld [vmem:[#allocation2 + $0x170] ss:$12 sps:$4 sm:$0xff]   ;;  %v2117_v45 = vld [vmem:[#allocation2 + $0x138] ss:$12 sps:$4 sm:$0xff]   ;;  %v2167_v48 = vld [vmem:[#allocation2 + $0x248] ss:$12 sps:$4 sm:$0xff]  }
  0x36   :  { %1916 = vmatprep.subr.bf16.mxu1 %v2142_v29  ;;  %v2163_v47 = vld [vmem:[#allocation2 + $0xb0] ss:$12 sps:$4 sm:$0xff]   ;;  %v55_v50 = vld [vmem:[%s2536_s0] sm:$0xff]  ;;  %v2121_v52 = vld [vmem:[#allocation2 + $0x16c] ss:$12 sps:$4 sm:$0xff]  }
  0x37   :  { %v2120_v49 = vld [vmem:[#allocation2 + $0x150] ss:$12 sps:$4 sm:$0xff]   ;;  %v2168_v53 = vld [vmem:[#allocation2 + $0x188] ss:$12 sps:$4 sm:$0xff]   ;;  %v2172_v55 = vld [vmem:[#allocation2 + $0x260] ss:$12 sps:$4 sm:$0xff]  }
  0x38   :  { %1059 = vmatpush1.bf16.msra.mxu0 %v2090_v9  ;;  %v61_v51 = vld [vmem:[%s2536_s0 + $0x30] sm:$0xff]  ;;  %v2173_v57 = vld [vmem:[#allocation2 + $0x1a0] ss:$12 sps:$4 sm:$0xff]   ;;  %v2177_v59 = vld [vmem:[#allocation2 + $0x278] ss:$12 sps:$4 sm:$0xff]  }
  0x39   :  { %1060 = vmatprep.subr.bf16.mxu0 %v2091_v10  ;;  %1917 = vmatpush3.bf16.msra.mxu1 %v2143_v30  ;;  %v67_v54 = vpack.c.bf16 %v61_v51, %v55_v50  ;;  %v2123_v56 = vld [vmem:[#allocation2 + $0x168] ss:$12 sps:$4 sm:$0xff]   ;;  %v2126_v58 = vld [vmem:[#allocation2 + $0x184] ss:$12 sps:$4 sm:$0xff]   ;;  %v2124_v60 = vld [vmem:[#allocation2 + $0x180] ss:$12 sps:$4 sm:$0xff]  }
  0x3a   :  { %1918 = vmatprep.subr.bf16.mxu1 %v2147_v33  ;;  %v2131_v61 = vld [vmem:[#allocation2 + $0x19c] ss:$12 sps:$4 sm:$0xff]   ;;  %v2178_v62 = vld [vmem:[#allocation2 + $0x1b8] ss:$12 sps:$4 sm:$0xff]   ;;  %v2136_v1 = vld [vmem:[#allocation2 + $0x1b4] ss:$12 sps:$4 sm:$0xff]  }
  0x3b   :  { %v2182_v63 = vld [vmem:[#allocation2 + $0x290] ss:$12 sps:$4 sm:$0xff]   ;;  %v2129_v0 = vld [vmem:[#allocation2 + $0x198] ss:$12 sps:$4 sm:$0xff]   ;;  %v2187_v3 = vld [vmem:[#allocation2 + $0x2a8] ss:$12 sps:$4 sm:$0xff]  }
  0x3c   :  { %1061 = vmatpush1.bf16.msra.mxu0 %v2093_v11  ;;  %v2183_v2 = vld [vmem:[#allocation2 + $0x1d0] ss:$12 sps:$4 sm:$0xff]   ;;  %v2141_v5 = vld [vmem:[#allocation2 + $0x1cc] ss:$12 sps:$4 sm:$0xff]   ;;  %v2188_v6 = vld [vmem:[#allocation2 + $0x1e8] ss:$12 sps:$4 sm:$0xff]  }
  0x3d   :  { %1062 = vmatprep.subr.bf16.mxu0 %v2094_v12  ;;  %1919 = vmatpush3.bf16.msra.mxu1 %v2148_v34  ;;  %v2134_v4 = vld [vmem:[#allocation2 + $0x1b0] ss:$12 sps:$4 sm:$0xff]   ;;  %v2192_v7 = vld [vmem:[#allocation2 + $0x2c0] ss:$12 sps:$4 sm:$0xff]   ;;  %v2139_v8 = vld [vmem:[#allocation2 + $0x1c8] ss:$12 sps:$4 sm:$0xff]  }
  0x3e   :  { %1920 = vmatprep.subr.bf16.mxu1 %v2152_v36  ;;  %v2146_v9 = vld [vmem:[#allocation2 + $0x1e4] ss:$12 sps:$4 sm:$0xff]   ;;  %v2193_v10 = vld [vmem:[#allocation2 + $0x200] ss:$12 sps:$4 sm:$0xff]   ;;  %v58_v12 = vld [vmem:[%s2536_s0 + $0x18] sm:$0xff] }
  0x3f   :  { %v2197_v11 = vld [vmem:[#allocation2 + $0x2d8] ss:$12 sps:$4 sm:$0xff]   ;;  %v64_v13 = vld [vmem:[%s2536_s0 + $0x48] sm:$0xff]  ;;  %v2202_v18 = vld [vmem:[#allocation2 + $0x2f0] ss:$12 sps:$4 sm:$0xff]  }
  0x40   :  { %1063 = vmatpush1.bf16.msra.mxu0 %v2096_v16  ;;  %v70_v14 = vpack.c.bf16 %v64_v13, %v58_v12  ;;  %v2144_v15 = vld [vmem:[#allocation2 + $0x1e0] ss:$12 sps:$4 sm:$0xff]   ;;  %v2151_v16 = vld [vmem:[#allocation2 + $0x1fc] ss:$12 sps:$4 sm:$0xff]   ;;  %v2149_v19 = vld [vmem:[#allocation2 + $0x1f8] ss:$12 sps:$4 sm:$0xff]  }
  0x41   :  { %1064 = vmatprep.subr.bf16.mxu0 %v2097_v17  ;;  %1921 = vmatpush3.bf16.msra.mxu1 %v2153_v39  ;;  %v2198_v17 = vld [vmem:[#allocation2 + $0x218] ss:$12 sps:$4 sm:$0xff]   ;;  %v57_v22 = vld [vmem:[%s2536_s0 + $0x10] sm:$0xff]  ;;  %v2212_v29 = vld [vmem:[#allocation2 + $0x3e0] ss:$12 sps:$4 sm:$0xff]  }
  0x42   :  { %1922 = vmatprep.subr.bf16.mxu1 %v2157_v40  ;;  %v63_v23 = vld [vmem:[%s2536_s0 + $0x40] sm:$0xff]  ;;  %v2208_v27 = vld [vmem:[#allocation2 + $0x308] ss:$12 sps:$4 sm:$0xff]   ;;  %v2223_v40 = vld [vmem:[#allocation2 + $0x350] ss:$12 sps:$4 sm:$0xff]  }
  0x43   :  { %v2460_v26 = vpack.c.bf16 %v63_v23, %v57_v22  ;;  %v2159_v30 = vld [vmem:[#allocation2 + $0x228] ss:$12 sps:$4 sm:$0xff]   ;;  %v2217_v33 = vld [vmem:[#allocation2 + $0x3f8] ss:$12 sps:$4 sm:$0xff]   ;;  %v2164_v34 = vld [vmem:[#allocation2 + $0x240] ss:$12 sps:$4 sm:$0xff]  }
  0x44   :  { %1065 = vmatpush1.bf16.msra.mxu0 %v2099_v20  ;;  %v2203_v20 = vld [vmem:[#allocation2 + $0x230] ss:$12 sps:$4 sm:$0xff]   ;;  %v2218_v36 = vld [vmem:[#allocation2 + $0x338] ss:$12 sps:$4 sm:$0xff]   ;;  %v2176_v39 = vld [vmem:[#allocation2 + $0x274] ss:$12 sps:$4 sm:$0xff]  }
  0x45   :  { %1066 = vmatprep.subr.bf16.mxu0 %v2100_v21  ;;  %1923 = vmatpush3.bf16.msra.mxu1 %v2158_v43  ;;  %v2156_v21 = vld [vmem:[#allocation2 + $0x214] ss:$12 sps:$4 sm:$0xff]   ;;  %v2181_v43 = vld [vmem:[#allocation2 + $0x28c] ss:$12 sps:$4 sm:$0xff]   ;;  %v2186_v50 = vld [vmem:[#allocation2 + $0x2a4] ss:$12 sps:$4 sm:$0xff]  }
  0x46   :  { %1924 = vmatprep.subr.bf16.mxu1 %v2162_v44  ;;  %v2228_v44 = vld [vmem:[#allocation2 + $0x368] ss:$12 sps:$4 sm:$0xff]   ;;  %v2233_v51 = vld [vmem:[#allocation2 + $0x380] ss:$12 sps:$4 sm:$0xff]   ;;  %v2229_v13 = vld [vmem:[#allocation2 + $0x378] ss:$12 sps:$4 sm:$0xff]  }
  0x47   :  { %v2231_v12 = vld [vmem:[#allocation2 + $0x37c] ss:$12 sps:$4 sm:$0xff]   ;;  %v2252_v22 = vld [vmem:[#allocation2 + $0x3f4] ss:$12 sps:$4 sm:$0xff]  }
  0x48   :  { %1067 = vmatpush1.bf16.msra.mxu0 %v2102_v24  ;;  %v2207_v24 = vld [vmem:[#allocation2 + $0x3c8] ss:$12 sps:$4 sm:$0xff]   ;;  %v2250_v23 = vld [vmem:[#allocation2 + $0x3f0] ss:$12 sps:$4 sm:$0xff]  }
  0x49   :  { %1068 = vmatprep.subr.bf16.mxu0 %v2103_v25  ;;  %1925 = vmatpush3.bf16.msra.mxu1 %v2163_v47  ;;  %v2154_v25 = vld [vmem:[#allocation2 + $0x210] ss:$12 sps:$4 sm:$0xff]  }
  0x4a   :  { %1932 = vmatprep.subr.bf16.mxu1 %v2167_v48  ;;  %v66_v47 = vld [vmem:[%s2536_s0 + $0x58] sm:$0xff] }
  0x4c   :  { %1069 = vmatpush1.bf16.msra.mxu0 %v2105_v28  ;;  %1212 = vmatmul.mubr.bf16.vlgmr.msra.gmra.mrb[0].mxu1 %v67_v54  ;;  %v2161_v28 = vld [vmem:[#allocation2 + $0x22c] ss:$12 sps:$4 sm:$0xff]  }
  0x4d   :  { %1070 = vmatprep.subr.bf16.mxu0 %v2106_v31  ;;  %1933 = vmatpush3.bf16.msra.mxu1 %v2168_v53  ;;  %v2166_v31 = vld [vmem:[#allocation2 + $0x244] ss:$12 sps:$4 sm:$0xff]   ;;  %v2184_v53 = vld [vmem:[#allocation2 + $0x2a0] ss:$12 sps:$4 sm:$0xff]  }
  0x4e   :  { %1934 = vmatprep.subr.bf16.mxu1 %v2172_v55  ;;  %1252 = vmatprep.mubr.bf16.mxu1 %v70_v14  ;;  %v2238_v55 = vld [vmem:[#allocation2 + $0x398] ss:$12 sps:$4 sm:$0xff]  }
  0x50   :  { %1071 = vmatpush1.bf16.msra.mxu0 %v2108_v32  ;;  %v2213_v32 = vld [vmem:[#allocation2 + $0x320] ss:$12 sps:$4 sm:$0xff]  }
  0x51   :  { %1072 = vmatprep.subr.bf16.mxu0 %v2109_v35  ;;  %1935 = vmatpush3.bf16.msra.mxu1 %v2173_v57  ;;  %v2171_v35 = vld [vmem:[#allocation2 + $0x25c] ss:$12 sps:$4 sm:$0xff]   ;;  %v2189_v57 = vld [vmem:[#allocation2 + $0x2b8] ss:$12 sps:$4 sm:$0xff]  }
  0x52   :  { %1936 = vmatprep.subr.bf16.mxu1 %v2177_v59  ;;  %v2243_v59 = vld [vmem:[#allocation2 + $0x3b0] ss:$12 sps:$4 sm:$0xff]  }
  0x54   :  { %1073 = vmatpush1.bf16.msra.mxu0 %v2111_v37  ;;  %v2222_v37 = vld [vmem:[#allocation2 + $0x410] ss:$12 sps:$4 sm:$0xff]  }
  0x55   :  { %1074 = vmatprep.subr.bf16.mxu0 %v2112_v38  ;;  %1937 = vmatpush3.bf16.msra.mxu1 %v2178_v62  ;;  %v2169_v38 = vld [vmem:[#allocation2 + $0x258] ss:$12 sps:$4 sm:$0xff]   ;;  %v2194_v62 = vld [vmem:[#allocation2 + $0x2d0] ss:$12 sps:$4 sm:$0xff]  }
  0x56   :  { %1938 = vmatprep.subr.bf16.mxu1 %v2182_v63  ;;  %v2201_v63 = vld [vmem:[#allocation2 + $0x2ec] ss:$12 sps:$4 sm:$0xff]  }
  0x58   :  { %1075 = vmatpush1.bf16.msra.mxu0 %v2114_v41  ;;  %v2227_v41 = vld [vmem:[#allocation2 + $0x428] ss:$12 sps:$4 sm:$0xff]  }
  0x59   :  { %1076 = vmatprep.subr.bf16.mxu0 %v2115_v42  ;;  %1939 = vmatpush3.bf16.msra.mxu1 %v2183_v2  ;;  %v2174_v42 = vld [vmem:[#allocation2 + $0x270] ss:$12 sps:$4 sm:$0xff]  }
  0x5a   :  { %1940 = vmatprep.subr.bf16.mxu1 %v2187_v3  ;;  %v2206_v2 = vld [vmem:[#allocation2 + $0x304] ss:$12 sps:$4 sm:$0xff]   ;;  %v2204_v3 = vld [vmem:[#allocation2 + $0x300] ss:$12 sps:$4 sm:$0xff]  }
  0x5c   :  { %1077 = vmatpush1.bf16.msra.mxu0 %v2117_v45  ;;  %v2232_v45 = vld [vmem:[#allocation2 + $0x440] ss:$12 sps:$4 sm:$0xff]  }
  0x5d   :  { %1078 = vmatprep.subr.bf16.mxu0 %v2118_v46  ;;  %1941 = vmatpush3.bf16.msra.mxu1 %v2188_v6  ;;  %v60_v46 = vld [vmem:[%s2536_s0 + $0x28] sm:$0xff]  ;;  %v2216_v6 = vld [vmem:[#allocation2 + $0x334] ss:$12 sps:$4 sm:$0xff]  }
  0x5e   :  { %1942 = vmatprep.subr.bf16.mxu1 %v2192_v7  ;;  %v72_v48 = vpack.c.bf16 %v66_v47, %v60_v46  ;;  %v2214_v7 = vld [vmem:[#allocation2 + $0x330] ss:$12 sps:$4 sm:$0xff]  }
  0x5f   :  { %v2275_v47 = vld [vmem:[#allocation4 + $0x18] sm:$0xff]  }
  0x60   :  { %1079 = vmatpush1.bf16.msra.mxu0 %v2120_v49  ;;  %v2179_v49 = vld [vmem:[#allocation2 + $0x288] ss:$12 sps:$4 sm:$0xff]  }
  0x61   :  { %1080 = vmatprep.subr.bf16.mxu0 %v2121_v52  ;;  %1943 = vmatpush3.bf16.msra.mxu1 %v2193_v10  ;;  %v2237_v52 = vld [vmem:[#allocation2 + $0x458] ss:$12 sps:$4 sm:$0xff]  }
  0x62   :  { %1944 = vmatprep.subr.bf16.mxu1 %v2197_v11  ;;  %v2226_v10 = vld [vmem:[#allocation2 + $0x364] ss:$12 sps:$4 sm:$0xff]   ;;  %v2224_v11 = vld [vmem:[#allocation2 + $0x360] ss:$12 sps:$4 sm:$0xff]  }
  0x64   :  { %1081 = vmatpush1.bf16.msra.mxu0 %v2123_v56  ;;  %v2242_v56 = vld [vmem:[#allocation2 + $0x470] ss:$12 sps:$4 sm:$0xff]  }
  0x65   :  { %1093 = vmatprep.subr.bf16.mxu0 %v2126_v58  ;;  %1945 = vmatpush3.bf16.msra.mxu1 %v2198_v17  ;;  %v2196_v58 = vld [vmem:[#allocation2 + $0x2d4] ss:$12 sps:$4 sm:$0xff]  }
  0x66   :  { %1946 = vmatprep.subr.bf16.mxu1 %v2202_v18  ;;  %v2239_v17 = vld [vmem:[#allocation2 + $0x3a8] ss:$12 sps:$4 sm:$0xff]   ;;  %v2246_v18 = vld [vmem:[#allocation2 + $0x3c4] ss:$12 sps:$4 sm:$0xff]  }
  0x67   :  { %1083 = vmatmul.mubr.bf16.vlgmr.msra.gmra.mrb[0].mxu0 %v67_v54  ;;  %v2191_v54 = vld [vmem:[#allocation2 + $0x2bc] ss:$12 sps:$4 sm:$0xff]  }
  0x68   :  { %1094 = vmatpush1.bf16.msra.mxu0 %v2124_v60  ;;  %1125 = vmatprep.mubr.bf16.mxu0 %v70_v14  ;;  %v59_v60 = vld [vmem:[%s2536_s0 + $0x20] sm:$0xff] }
  0x69   :  { %1095 = vmatprep.subr.bf16.mxu0 %v2131_v61  ;;  %1947 = vmatpush3.bf16.msra.mxu1 %v2203_v20  ;;  %v65_v61 = vld [vmem:[%s2536_s0 + $0x50] sm:$0xff]  ;;  %v2249_v20 = vld [vmem:[#allocation2 + $0x3dc] ss:$12 sps:$4 sm:$0xff]  }
  0x6a   :  { %1954 = vmatprep.subr.bf16.mxu1 %v2207_v24  ;;  %v2236_v14 = vld [vmem:[#allocation2 + $0x394] ss:$12 sps:$4 sm:$0xff]   ;;  %v2255_v24 = vld [vmem:[#allocation2 + $0x40c] ss:$12 sps:$4 sm:$0xff]  }
  0x6c   :  { %1096 = vmatpush1.bf16.msra.mxu0 %v2129_v0  ;;  %1253 = vmatmul.mubr.bf16.vlgmr.msra.gmra.mrb[4].mxu1 %v2460_v26  ;;  %v2475_v0 = vpack.c.bf16 %v65_v61, %v59_v60  ;;  %v2370_v60 = vmov 0.0  }
  0x6d   :  { %1097 = vmatprep.subr.bf16.mxu0 %v2136_v1  ;;  %1955 = vmatpush3.bf16.msra.mxu1 %v2208_v27  ;;  %v2199_v1 = vld [vmem:[#allocation2 + $0x2e8] ss:$12 sps:$4 sm:$0xff]   ;;  %v2256_v27 = vld [vmem:[#allocation2 + $0x420] ss:$12 sps:$4 sm:$0xff]  }
  0x6e   :  { %1956 = vmatprep.subr.bf16.mxu1 %v2212_v29  ;;  %1293 = vmatprep.mubr.bf16.mxu1 %v72_v48  ;;  %v2259_v29 = vld [vmem:[#allocation2 + $0x438] ss:$12 sps:$4 sm:$0xff]  }
  0x70   :  { %1098 = vmatpush1.bf16.msra.mxu0 %v2134_v4  ;;  %v2211_v4 = vld [vmem:[#allocation2 + $0x31c] ss:$12 sps:$4 sm:$0xff]  }
  0x71   :  { %1099 = vmatprep.subr.bf16.mxu0 %v2141_v5  ;;  %1957 = vmatpush3.bf16.msra.mxu1 %v2213_v32  ;;  %v2209_v5 = vld [vmem:[#allocation2 + $0x318] ss:$12 sps:$4 sm:$0xff]  }
  0x72   :  { %1958 = vmatprep.subr.bf16.mxu1 %v2217_v33  ;;  %v2267_v32 = vld [vmem:[#allocation2 + $0x46c] ss:$12 sps:$4 sm:$0xff]   ;;  %v2265_v33 = vld [vmem:[#allocation2 + $0x468] ss:$12 sps:$4 sm:$0xff]  }
  0x74   :  { %1100 = vmatpush1.bf16.msra.mxu0 %v2139_v8  ;;  %v2221_v8 = vld [vmem:[#allocation2 + $0x34c] ss:$12 sps:$4 sm:$0xff]  }
  0x75   :  { %1101 = vmatprep.subr.bf16.mxu0 %v2146_v9  ;;  %1959 = vmatpush3.bf16.msra.mxu1 %v2218_v36  ;;  %v2219_v9 = vld [vmem:[#allocation2 + $0x348] ss:$12 sps:$4 sm:$0xff]  }
  0x76   :  { %1960 = vmatprep.subr.bf16.mxu1 %v2222_v37  ;;  %v2270_v36 = vld [vmem:[#allocation4 + $0x48] sm:$0xff]  }
  0x77   :  { %v2271_v37 = vld [vmem:[#allocation4 + $0x8] sm:$0xff]  }
  0x78   :  { %1102 = vmatpush1.bf16.msra.mxu0 %v2144_v15  ;;  %v2234_v15 = vld [vmem:[#allocation2 + $0x390] ss:$12 sps:$4 sm:$0xff]  }
  0x79   :  { %1103 = vmatprep.subr.bf16.mxu0 %v2151_v16  ;;  %1961 = vmatpush3.bf16.msra.mxu1 %v2223_v40  ;;  %v2241_v16 = vld [vmem:[#allocation2 + $0x3ac] ss:$12 sps:$4 sm:$0xff]  }
  0x7a   :  { %1962 = vmatprep.subr.bf16.mxu1 %v2227_v41  ;;  %v2274_v40 = vld [vmem:[#allocation4 + $0x58] sm:$0xff]  }
  0x7c   :  { %1104 = vmatpush1.bf16.msra.mxu0 %v2149_v19  ;;  %v2244_v19 = vld [vmem:[#allocation2 + $0x3c0] ss:$12 sps:$4 sm:$0xff]  }
  0x7d   :  { %1105 = vmatprep.subr.bf16.mxu0 %v2156_v21  ;;  %1963 = vmatpush3.bf16.msra.mxu1 %v2228_v44  ;;  %v2247_v21 = vld [vmem:[#allocation2 + $0x3d8] ss:$12 sps:$4 sm:$0xff]  }
  0x7e   :  { %1964 = vmatprep.subr.bf16.mxu1 %v2232_v45 }
  0x80   :  { %1106 = vmatpush1.bf16.msra.mxu0 %v2154_v25  ;;  %v2253_v25 = vld [vmem:[#allocation2 + $0x408] ss:$12 sps:$4 sm:$0xff]  }
  0x81   :  { %1107 = vmatprep.subr.bf16.mxu0 %v2161_v28  ;;  %1965 = vmatpush3.bf16.msra.mxu1 %v2233_v51  ;;  %v2261_v28 = vld [vmem:[#allocation2 + $0x43c] ss:$12 sps:$4 sm:$0xff]  }
  0x82   :  { %1966 = vmatprep.subr.bf16.mxu1 %v2237_v52  ;;  %v2279_v51 = vld [vmem:[#allocation4 + $0x28] sm:$0xff]   ;;  %v2280_v52 = vld [vmem:[#allocation4 + $0x70] sm:$0xff]  }
  0x84   :  { %1108 = vmatpush1.bf16.msra.mxu0 %v2159_v30  ;;  %v2264_v30 = vld [vmem:[#allocation2 + $0x454] ss:$12 sps:$4 sm:$0xff]  }
  0x85   :  { %1109 = vmatprep.subr.bf16.mxu0 %v2166_v31  ;;  %1967 = vmatpush3.bf16.msra.mxu1 %v2238_v55  ;;  %v2262_v31 = vld [vmem:[#allocation2 + $0x450] ss:$12 sps:$4 sm:$0xff]  }
  0x86   :  { %1968 = vmatprep.subr.bf16.mxu1 %v2242_v56  ;;  %v2282_v55 = vld [vmem:[#allocation4 + $0x78] sm:$0xff]  }
  0x88   :  { %1110 = vmatpush1.bf16.msra.mxu0 %v2164_v34  ;;  %v2268_v34 = vld [vmem:[#allocation4 + $0x40] sm:$0xff]  }
  0x89   :  { %1111 = vmatprep.subr.bf16.mxu0 %v2171_v35  ;;  %1969 = vmatpush3.bf16.msra.mxu1 %v2243_v59  ;;  %v2269_v35 = vld [vmem:[#allocation4] sm:$0xff]  }
  0x8a   :  { %1976 = vmatprep.subr.bf16.mxu1 %v2268_v34  ;;  %v265_v59 = vld [vmem:[%s2538_s2] sm:$0x7] }
  0x8c   :  { %1112 = vmatpush1.bf16.msra.mxu0 %v2169_v38  ;;  %1294 = vmatmul.mubr.bf16.vlgmr.msra.gmra.mrb[8].mxu1 %v2475_v0  ;;  %v2272_v38 = vld [vmem:[#allocation4 + $0x50] sm:$0xff]  }
  0x8d   :  { %1113 = vmatprep.subr.bf16.mxu0 %v2176_v39  ;;  %1977 = vmatpush3.bf16.msra.mxu1 %v2269_v35  ;;  %v2273_v39 = vld [vmem:[#allocation4 + $0x10] sm:$0xff]  }
  0x8e   :  { %1978 = vmatprep.subr.bf16.mxu1 %v2270_v36 }
  0x90   :  { %1114 = vmatpush1.bf16.msra.mxu0 %v2174_v42 }
  0x91   :  { %1115 = vmatprep.subr.bf16.mxu0 %v2181_v43  ;;  %1979 = vmatpush3.bf16.msra.mxu1 %v2271_v37  ;;  %v2284_v37 = vld [vmem:[#allocation4 + $0x80] sm:$0xff]  }
  0x92   :  { %1980 = vmatprep.subr.bf16.mxu1 %v2272_v38  ;;  %v2285_v38 = vld [vmem:[#allocation4 + $0x88] sm:$0xff]  }
  0x94   :  { %1116 = vmatpush1.bf16.msra.mxu0 %v2179_v49  ;;  %v2277_v49 = vld [vmem:[#allocation4 + $0x20] sm:$0xff]  }
  0x95   :  { %1117 = vmatprep.subr.bf16.mxu0 %v2186_v50  ;;  %1981 = vmatpush3.bf16.msra.mxu1 %v2273_v39  ;;  %v2278_v50 = vld [vmem:[#allocation4 + $0x68] sm:$0xff]   ;;  %v2286_v39 = vld [vmem:[#allocation4 + $0x90] sm:$0xff]  }
  0x96   :  { %1982 = vmatprep.subr.bf16.mxu1 %v2274_v40  ;;  %v2287_v40 = vld [vmem:[#allocation4 + $0x98] sm:$0xff]  }
  0x98   :  { %1118 = vmatpush1.bf16.msra.mxu0 %v2184_v53  ;;  %v267_v53 = vlaneseq }
  0x99   :  { %1119 = vmatprep.subr.bf16.mxu0 %v2191_v54  ;;  %1983 = vmatpush3.bf16.msra.mxu1 %v2275_v47  ;;  %v2281_v54 = vld [vmem:[#allocation4 + $0x30] sm:$0xff]  }
  0x9a   :  { %v268_v56 = vshrl.u32 %v267_v53, 7  ;;  %v2294_v47 = vld [vmem:[%s2541_s5 + $0x10] sm:$0xff]  }
  0x9c   :  { %1120 = vmatpush1.bf16.msra.mxu0 %v2189_v57  ;;  %v2283_v57 = vld [vmem:[#allocation4 + $0x38] sm:$0xff]  }
  0x9d   :  { %1121 = vmatprep.subr.bf16.mxu0 %v2196_v58  ;;  %v277_v58 = vsub.s32 2, %v268_v56 }
  0x9f   :  { %v278_v61 = vrot.slane %v265_v59, %v277_v58 }
  0xa0   :  { %1122 = vmatpush1.bf16.msra.mxu0 %v2194_v62 }
  0xa1   :  { %1123 = vmatprep.subr.bf16.mxu0 %v2201_v63 }
  0xa4   :  { %1124 = vmatpush1.bf16.msra.mxu0 %v2199_v1 }
  0xa5   :  { %1136 = vmatprep.subr.bf16.mxu0 %v2206_v2 }
  0xa7   :  { %1126 = vmatmul.mubr.bf16.vlgmr.msra.gmra.mrb[0].mxu0 %v2460_v26  ;;  %v2258_v26 = vld [vmem:[#allocation2 + $0x424] ss:$12 sps:$4 sm:$0xff]  }
  0xa8   :  { %1137 = vmatpush1.bf16.msra.mxu0 %v2204_v3  ;;  %1168 = vmatprep.mubr.bf16.mxu0 %v72_v48  ;;  %v2276_v48 = vld [vmem:[#allocation4 + $0x60] sm:$0xff]  }
  0xa9   :  { %1138 = vmatprep.subr.bf16.mxu0 %v2211_v4  ;;  %1984 = vmatprep.subr.bf16.mxu1 %v2276_v48  ;;  %v2295_v48 = vld [vmem:[%s2541_s5 + $0x18] sm:$0xff]  }
  0xaa   :  { %1985 = vmatpush3.bf16.msra.mxu1 %v2277_v49  ;;  %v2296_v49 = vld [vmem:[%s2541_s5 + $0x20] sm:$0xff]  }
  0xab   :  { %1986 = vmatprep.subr.bf16.mxu1 %v2278_v50  ;;  %v2297_v50 = vld [vmem:[%s2541_s5 + $0x28] sm:$0xff]  }
  0xac   :  { %1139 = vmatpush1.bf16.msra.mxu0 %v2209_v5 }
  0xad   :  { %1140 = vmatprep.subr.bf16.mxu0 %v2216_v6 }
  0xae   :  { %1987 = vmatpush3.bf16.msra.mxu1 %v2279_v51  ;;  %v2298_v51 = vld [vmem:[%s2541_s5 + $0x30] sm:$0xff]  }
  0xaf   :  { %1988 = vmatprep.subr.bf16.mxu1 %v2280_v52  ;;  %v2299_v52 = vld [vmem:[%s2541_s5 + $0x38] sm:$0xff]  }
  0xb0   :  { %1141 = vmatpush1.bf16.msra.mxu0 %v2214_v7 }
  0xb1   :  { %1142 = vmatprep.subr.bf16.mxu0 %v2221_v8 }
  0xb2   :  { %1989 = vmatpush3.bf16.msra.mxu1 %v2281_v54 }
  0xb3   :  { %1990 = vmatprep.subr.bf16.mxu1 %v2282_v55 }
  0xb4   :  { %1143 = vmatpush1.bf16.msra.mxu0 %v2219_v9 }
  0xb5   :  { %1144 = vmatprep.subr.bf16.mxu0 %v2226_v10 }
  0xb6   :  { %1991 = vmatpush3.bf16.msra.mxu1 %v2283_v57 }
  0xb7   :  { %2016 = vmatprep.subr.bf16.mxu1 %v2370_v60 }
  0xb8   :  { %1145 = vmatpush1.bf16.msra.mxu0 %v2224_v11 }
  0xb9   :  { %1146 = vmatprep.subr.bf16.mxu0 %v2231_v12 }
  0xbc   :  { %1147 = vmatpush1.bf16.msra.mxu0 %v2229_v13 }
  0xbd   :  { %1148 = vmatprep.subr.bf16.mxu0 %v2236_v14 }
  0xc0   :  { %1149 = vmatpush1.bf16.msra.mxu0 %v2234_v15 }
  0xc1   :  { %1150 = vmatprep.subr.bf16.mxu0 %v2241_v16 }
  0xc4   :  { %1151 = vmatpush1.bf16.msra.mxu0 %v2239_v17 }
  0xc5   :  { %1152 = vmatprep.subr.bf16.mxu0 %v2246_v18 }
  0xc8   :  { %1153 = vmatpush1.bf16.msra.mxu0 %v2244_v19  ;;  %v269_v19 = vsub.s32 0, %v268_v56 }
  0xc9   :  { %1154 = vmatprep.subr.bf16.mxu0 %v2249_v20  ;;  %v273_v20 = vsub.s32 1, %v268_v56 }
  0xcc   :  { %1155 = vmatpush1.bf16.msra.mxu0 %v2247_v21  ;;  %v270_v21 = vrot.slane %v265_v59, %v269_v19 }
  0xcd   :  { %1156 = vmatprep.subr.bf16.mxu0 %v2252_v22  ;;  %v274_v22 = vrot.slane %v265_v59, %v273_v20  ;;  %v1867_v59 = vld [vmem:[%s2540_s4] ss:$0 sm:$0xff] }
  0xd0   :  { %1157 = vmatpush1.bf16.msra.mxu0 %v2250_v23 }
  0xd1   :  { %1158 = vmatprep.subr.bf16.mxu0 %v2255_v24 }
  0xd4   :  { %1159 = vmatpush1.bf16.msra.mxu0 %v2253_v25 }
  0xd5   :  { %1160 = vmatprep.subr.bf16.mxu0 %v2258_v26 }
  0xd8   :  { %1161 = vmatpush1.bf16.msra.mxu0 %v2256_v27 }
  0xd9   :  { %1162 = vmatprep.subr.bf16.mxu0 %v2261_v28 }
  0xdc   :  { %1163 = vmatpush1.bf16.msra.mxu0 %v2259_v29 }
  0xdd   :  { %1164 = vmatprep.subr.bf16.mxu0 %v2264_v30 }
  0xe0   :  { %1165 = vmatpush1.bf16.msra.mxu0 %v2262_v31 }
  0xe1   :  { %1166 = vmatprep.subr.bf16.mxu0 %v2267_v32 }
  0xe4   :  { %1167 = vmatpush1.bf16.msra.mxu0 %v2265_v33 }
  0xe7   :  { %1169 = vmatmul.mubr.bf16.vlgmr.msra.gmra.mrb[0].mxu0 %v2475_v0 }
 0x11f   :  { %v1926_v41 = vpop.f32.mrb[0].mxu1 }
 0x120   :  { %v1927_v42 = vpop.f32.mrb[1].mxu1 }
 0x121   :  { %v1928_v43 = vadd.f32 %v1927_v42, %v1926_v41  ;;  %v1929_v44 = vpop.f32.mrb[2].mxu1  ;;  %v2288_v41 = vld [vmem:[#allocation4 + $0xa0] sm:$0xff]   ;;  %v2289_v42 = vld [vmem:[#allocation4 + $0xa8] sm:$0xff]  }
 0x122   :  { %v1930_v45 = vpop.f32.mrb[3].mxu1 }
 0x123   :  { %v1931_v46 = vadd.f32 %v1930_v45, %v1929_v44  ;;  %v1214_v62 = vadd.f32 %v1928_v43, %v278_v61  ;;  %v2290_v43 = vld [vmem:[#allocation4 + $0xb0] sm:$0xff]   ;;  %v2291_v44 = vld [vmem:[#allocation4 + $0xb8] sm:$0xff]   ;;  %v2292_v45 = vld [vmem:[%s2541_s5] sm:$0xff]  }
 0x125   :  { %v1217_v1 = vadd.f32 %v1931_v46, %v278_v61  ;;  %v2293_v46 = vld [vmem:[%s2541_s5 + $0x8] sm:$0xff]  }
 0x13f   :  { %v1948_v63 = vpop.f32.mrb[4].mxu1 }
 0x140   :  { %v1949_v0 = vpop.f32.mrb[5].mxu1 }
 0x141   :  { %v1950_v2 = vadd.f32 %v1949_v0, %v1948_v63  ;;  %v1951_v3 = vpop.f32.mrb[6].mxu1 }
 0x142   :  { %v1952_v4 = vpop.f32.mrb[7].mxu1 }
 0x143   :  { %v1255_v5 = vadd.f32 %v1950_v2, %v1214_v62  ;;  %v1953_v6 = vadd.f32 %v1952_v4, %v1951_v3 }
 0x145   :  { %v1258_v7 = vadd.f32 %v1953_v6, %v1217_v1 }
 0x15f   :  { %v1970_v8 = vpop.f32.mrb[8].mxu1 }
 0x160   :  { %v1971_v9 = vpop.f32.mrb[9].mxu1 }
 0x161   :  { %v1972_v10 = vadd.f32 %v1971_v9, %v1970_v8  ;;  %v1973_v11 = vpop.f32.mrb[10].mxu1 }
 0x162   :  { %v1974_v12 = vpop.f32.mrb[11].mxu1 }
 0x163   :  { %v1296_v13 = vadd.f32 %v1972_v10, %v1255_v5  ;;  %v1975_v14 = vadd.f32 %v1974_v12, %v1973_v11 }
 0x165   :  { %2300 = vtanh.f32 %v1296_v13  ;;  %v1299_v15 = vadd.f32 %v1975_v14, %v1258_v7  ;;  %v1892_v7 = vld [vmem:[%s2542_s6] ss:$0 sm:$0xff] }
 0x167   :  { %2302 = vtanh.f32 %v1299_v15 }
 0x16f   :  { %v2301_v16 = vpop.eup %2300 }
 0x171   :  { %v2303_v17 = vpop.eup %2302 }
 0x172   :  { %v1310_v18 = vpack.c.bf16 %v2303_v17, %v2301_v16 }
 0x1ba   :  { %v1170_v23 = vpop.f32.mrb[0].mxu0 }
 0x1bb   :  { %v2056_v24 = vadd.f32 %v1170_v23, %v270_v21  ;;  %v1172_v25 = vpop.f32.mrb[1].mxu0 }
 0x1bc   :  { %v2057_v26 = vadd.f32 %v1172_v25, %v274_v22  ;;  %v1174_v27 = vpop.f32.mrb[2].mxu0 }
 0x1bd   :  { %2304 = vtanh.f32 %v2056_v24  ;;  %v2058_v28 = vadd.f32 %v1174_v27, %v270_v21  ;;  %v1176_v29 = vpop.f32.mrb[3].mxu0 }
 0x1be   :  { %2306 = vtanh.f32 %v2057_v26  ;;  %v2059_v30 = vadd.f32 %v1176_v29, %v274_v22 }
 0x1bf   :  { %2308 = vtanh.f32 %v2058_v28 }
 0x1c0   :  { %2310 = vtanh.f32 %v2059_v30 }
 0x1c7   :  { %v2305_v31 = vpop.eup %2304 }
 0x1c8   :  { %v2307_v32 = vpop.eup %2306 }
 0x1c9   :  { %v2309_v33 = vpop.eup %2308 }
 0x1ca   :  { %v2311_v34 = vpop.eup %2310  ;;  %v1308_v35 = vpack.c.bf16 %v2309_v33, %v2305_v31 }
 0x1cb   :  { %v1309_v36 = vpack.c.bf16 %v2311_v34, %v2307_v32 }
 0x1cd   :  { %1542 = vmatprep.mubr.bf16.mxu1 %v1309_v36 }
 0x1ce   :  { %1543 = vmatmul.mubr.bf16.vlgmr.msra.gmra.mrb[12].mxu1 %v1308_v35 }
 0x1cf   :  { %2017 = vmatpush3.bf16.msra.mxu1 %v2284_v37  ;;  %2032 = vmatprep.mubr.msk.bf16.mxu1 %vm2371_vm0, %v2370_v60 }
 0x1d0   :  { %2018 = vmatprep.subr.bf16.mxu1 %v2370_v60 }
 0x1d3   :  { %2019 = vmatpush3.bf16.msra.mxu1 %v2285_v38 }
 0x1d4   :  { %2020 = vmatprep.subr.bf16.mxu1 %v2370_v60 }
 0x1d7   :  { %2021 = vmatpush3.bf16.msra.mxu1 %v2286_v39 }
 0x1d8   :  { %2022 = vmatprep.subr.bf16.mxu1 %v2370_v60 }
 0x1db   :  { %2023 = vmatpush3.bf16.msra.mxu1 %v2287_v40 }
 0x1dc   :  { %2024 = vmatprep.subr.bf16.mxu1 %v2370_v60 }
 0x1df   :  { %2025 = vmatpush3.bf16.msra.mxu1 %v2288_v41 }
 0x1e0   :  { %2026 = vmatprep.subr.bf16.mxu1 %v2370_v60 }
 0x1e3   :  { %2027 = vmatpush3.bf16.msra.mxu1 %v2289_v42 }
 0x1e4   :  { %2028 = vmatprep.subr.bf16.mxu1 %v2370_v60 }
 0x1e7   :  { %2029 = vmatpush3.bf16.msra.mxu1 %v2290_v43 }
 0x1e8   :  { %2030 = vmatprep.subr.bf16.mxu1 %v2370_v60 }
 0x1eb   :  { %2031 = vmatpush3.bf16.msra.mxu1 %v2291_v44 }
 0x1ec   :  { %2036 = vmatprep.subr.bf16.mxu1 %v2370_v60 }
 0x1ee   :  { %2033 = vmatmul.mubr.bf16.vlgmr.msra.gmra.mrb[16].mxu1 %v1310_v18 }
 0x1ef   :  { %2052 = vmatprep.mubr.msk.bf16.mxu1 %vm2371_vm0, %v2370_v60  ;;  %2037 = vmatpush3.bf16.msra.mxu1 %v2292_v45 }
 0x1f0   :  { %2038 = vmatprep.subr.bf16.mxu1 %v2370_v60 }
 0x1f3   :  { %2039 = vmatpush3.bf16.msra.mxu1 %v2293_v46 }
 0x1f4   :  { %2040 = vmatprep.subr.bf16.mxu1 %v2370_v60 }
 0x1f7   :  { %2041 = vmatpush3.bf16.msra.mxu1 %v2294_v47 }
 0x1f8   :  { %2042 = vmatprep.subr.bf16.mxu1 %v2370_v60 }
 0x1fb   :  { %2043 = vmatpush3.bf16.msra.mxu1 %v2295_v48 }
 0x1fc   :  { %2044 = vmatprep.subr.bf16.mxu1 %v2370_v60 }
 0x1ff   :  { %2045 = vmatpush3.bf16.msra.mxu1 %v2296_v49 }
 0x200   :  { %2046 = vmatprep.subr.bf16.mxu1 %v2370_v60 }
 0x203   :  { %2047 = vmatpush3.bf16.msra.mxu1 %v2297_v50 }
 0x204   :  { %2048 = vmatprep.subr.bf16.mxu1 %v2370_v60 }
 0x207   :  { %2049 = vmatpush3.bf16.msra.mxu1 %v2298_v51 }
 0x208   :  { %2050 = vmatprep.subr.bf16.mxu1 %v2370_v60 }
 0x20b   :  { %2051 = vmatpush3.bf16.msra.mxu1 %v2299_v52 }
 0x2a1   :  { %v1992_v53 = vpop.f32.mrb[12].mxu1 }
 0x2a2   :  { %v1993_v54 = vpop.f32.mrb[13].mxu1 }
 0x2a3   :  { %v1994_v55 = vadd.f32 %v1993_v54, %v1992_v53  ;;  %v1995_v56 = vpop.f32.mrb[14].mxu1 }
 0x2a4   :  { %v1996_v57 = vpop.f32.mrb[15].mxu1 }
 0x2a5   :  { %v1997_v58 = vadd.f32 %v1996_v57, %v1995_v56  ;;  %v1545_v61 = vadd.f32 %v1994_v55, %v1867_v59 }
 0x2a7   :  { %v1548_v1 = vadd.f32 %v1997_v58, %v1867_v59 }
 0x2c1   :  { %v1585_v62 = vpop.f32.mrb[16].mxu1 }
 0x2c2   :  { %v1586_v63 = vadd.f32 %v1585_v62, %v1545_v61  ;;  %v2034_v0 = vpop.f32.mrb[17].mxu1 }
 0x2c3   :  { %v1588_v2 = vpop.f32.mrb[18].mxu1 }
 0x2c4   :  { %v1589_v3 = vadd.f32 %v1588_v2, %v1548_v1  ;;  %v2035_v4 = vpop.f32.mrb[19].mxu1  ;;  %2312 = vtanh.f32 %v1586_v63 }
 0x2c6   :  { %2314 = vtanh.f32 %v1589_v3 }
 0x2ce   :  { %v2313_v60 = vpop.eup %2312 }
 0x2d0   :  { %v2315_v5 = vpop.eup %2314 }
 0x2d1   :  { %v1594_v6 = vpack.c.bf16 %v2315_v5, %v2313_v60 }
 0x2d3   :  { %2053 = vmatmul.mubr.bf16.vlgmr.msra.gmra.mrb[20].mxu1 %v1594_v6 }
 0x3a6   :  { %v1700_v8 = vpop.f32.mrb[20].mxu1 }
 0x3a7   :  { %v2054_v9 = vpop.f32.mrb[21].mxu1  ;;  %v1701_v11 = vadd.f32 %v1892_v7, %v1700_v8 }
 0x3a8   :  { %v1703_v10 = vpop.f32.mrb[22].mxu1 }
 0x3a9   :  { %v1704_v12 = vadd.f32 %v1892_v7, %v1703_v10  ;;  %v2055_v13 = vpop.f32.mrb[23].mxu1 }
 0x3ab   :  { %v1908_v14 = vpack.c.bf16 %v1704_v12, %v1701_v11 }
 0x3ad   :  { %1909 = vst [vmem:[%s2543_s7] sm:$0xff] %v1908_v14  }
 0x3ae   :  { %1721 = vsyncpa [#allocation3], 1 }
 0x3af   :  { %1722 = vsyncpa [#allocation5], 1 }

</bundles_post_ra>
